<compile_context>
chip_gen: v7x
topology: tpu7x:2x2x1
jax: 0.10.0
libtpu: 0.0.40
codegen_flags: <defaults>
</compile_context>

<pallas_src>
import functools

import jax
import jax.numpy as jnp
from jax import lax
from jax.experimental import pallas as pl
from jax.experimental.pallas import tpu as pltpu


def _pmf_kernel(style, u_ids_ref, i_ids_ref, ut_ref, it_ref, out_ref):
    """One grid step: TB predictions via one-hot MXU gathers.

    u_ids_ref, i_ids_ref : (1, TB) int32 VMEM blocks (lane-major ids)
    ut_ref, it_ref       : (F, user_rows) / (F, item_rows) whole tables in VMEM
    out_ref              : (1, TB) float32 output block
    """
    u_rows = ut_ref.shape[1]
    i_rows = it_ref.shape[1]
    tb = out_ref.shape[1]

    u_ids = u_ids_ref[...]                                   # (1, tb) int32
    i_ids = i_ids_ref[...]                                   # (1, tb) int32

    # One-hot selection matrices, (rows, tb): element [r, b] == 1 iff id[b]==r.
    # Padded / out-of-range ids give an all-zero column -> prediction 0.
    u_iota = lax.broadcasted_iota(jnp.int32, (u_rows, tb), 0)
    i_iota = lax.broadcasted_iota(jnp.int32, (i_rows, tb), 0)
    one_hot_u = (u_iota == u_ids).astype(ut_ref.dtype)       # (u_rows, tb)
    one_hot_i = (i_iota == i_ids).astype(it_ref.dtype)       # (i_rows, tb)

    # MXU gathers: (F, rows) @ (rows, tb) -> (F, tb); batch is lane-major so
    # no transposes are needed anywhere downstream.
    eu = jnp.dot(ut_ref[...], one_hot_u, preferred_element_type=jnp.float32)
    ei = jnp.dot(it_ref[...], one_hot_i, preferred_element_type=jnp.float32)

    prod = eu * ei                                           # (F, tb) f32, VPU
    # Sublane reduction over F -> (1, tb), already in the output layout.
    # (Could also be an MXU reduce: ones((1, F)) @ prod, if XLU ever binds.)
    pred = jnp.sum(prod, axis=0, keepdims=True)              # (1, tb)
    if style == "implicit":
        pred = jax.nn.sigmoid(pred)

    out_ref[...] = pred.astype(out_ref.dtype)                # single lane-dense vst


def pmf_forward(user, item, user_table, item_table, style="explicit", tb=512):
    """Pallas implementation of PMF.forward.

    user, item  : int index vectors of shape (B,)
    user_table  : (user_num, factor_num) embedding weights
    item_table  : (item_num, factor_num) embedding weights
    returns     : (B,) float32 predictions
    """
    assert user.ndim == 1 and user.shape == item.shape
    b = user.shape[0]
    u_rows, f = user_table.shape
    i_rows, f2 = item_table.shape
    assert f2 == f

    # Lane-dense batch tile: multiple of 128, no larger than needed.
    tb = min(tb, pl.cdiv(b, 128) * 128)
    tb = max(128, (tb // 128) * 128)
    b_pad = pl.cdiv(b, tb) * tb
    pad = b_pad - b

    # Ids as lane-major (1, B_pad) int32 rows; padded ids = -1 -> zero one-hot
    # column -> prediction 0 (sliced off below).
    u_ids = jnp.pad(user.astype(jnp.int32), (0, pad),
                    constant_values=-1).reshape(1, b_pad)
    i_ids = jnp.pad(item.astype(jnp.int32), (0, pad),
                    constant_values=-1).reshape(1, b_pad)

    # Wrapper-side layout plumbing: transposed tables (F, rows) so the MXU
    # gather lands the batch in the lane dimension.
    ut = user_table.T
    it = item_table.T

    # Explicit VMEM budget: tables once (+ one-hots, f32 temps, id/out blocks)
    # plus headroom; keeps the default 16/32 MiB scoped cap from rejecting
    # realistic tables.
    elt = jnp.dtype(user_table.dtype).itemsize
    table_bytes = (u_rows + i_rows) * f * elt
    work_bytes = 4 * tb * (u_rows + i_rows + 4 * f) + 16 * tb * 4
    vmem_limit = int(min(100 << 20, table_bytes + work_bytes + (8 << 20)))

    kernel = functools.partial(_pmf_kernel, style)

    out = pl.pallas_call(
        kernel,
        out_shape=jax.ShapeDtypeStruct((1, b_pad), jnp.float32),
        grid=(b_pad // tb,),
        in_specs=[
            pl.BlockSpec((1, tb), lambda g: (0, g)),
            pl.BlockSpec((1, tb), lambda g: (0, g)),
            # Whole tables resident in VMEM once (no double buffering).
            pl.BlockSpec(memory_space=pltpu.MemorySpace.VMEM),
            pl.BlockSpec(memory_space=pltpu.MemorySpace.VMEM),
        ],
        out_specs=pl.BlockSpec((1, tb), lambda g: (0, g)),
        compiler_params=pltpu.CompilerParams(
            dimension_semantics=("parallel",),
            vmem_limit_bytes=vmem_limit),
    )(u_ids, i_ids, ut, it)

    return out.reshape(b_pad)[:b]


if __name__ == "__main__":
    key = jax.random.PRNGKey(0)
    k1, k2, k3, k4 = jax.random.split(key, 4)

    # Small shapes consistent with the module: PMF(user_num, item_num, factor_num=128)
    user_num, item_num, factor_num = 16, 32, 128
    batch = 8

    # Deterministic parameter init mirroring nn.init.normal_(std=0.01).
    embed_user_weight = 0.01 * jax.random.normal(
        k1, (user_num, factor_num), dtype=jnp.float32)
    embed_item_weight = 0.01 * jax.random.normal(
        k2, (item_num, factor_num), dtype=jnp.float32)

    user = jax.random.randint(k3, (batch,), 0, user_num, dtype=jnp.int32)
    item = jax.random.randint(k4, (batch,), 0, item_num, dtype=jnp.int32)

    # style='explicit'
    out_explicit = jax.block_until_ready(
        pmf_forward(user, item, embed_user_weight, embed_item_weight,
                    style="explicit"))

    # style='implicit'
    out_implicit = jax.block_until_ready(
        pmf_forward(user, item, embed_user_weight, embed_item_weight,
                    style="implicit"))

    # Pure-JAX reference check.
    ref = jnp.sum(embed_user_weight[user] * embed_item_weight[item], axis=-1)
    assert out_explicit.shape == (batch,)
    assert jnp.allclose(out_explicit, ref, atol=1e-6, rtol=1e-5)
    assert jnp.allclose(out_implicit, jax.nn.sigmoid(ref), atol=1e-6, rtol=1e-5)

    print("KERNEL_OK")
</pallas_src>

<mosaic_0001>
module attributes {stable_mosaic.version = 11 : i64} {
  func.func @_pmf_kernel(%arg0: i32, %arg1: memref<1x128xi32, #tpu.memory_space<vmem>>, %arg2: memref<1x128xi32, #tpu.memory_space<vmem>>, %arg3: memref<128x16xf32, #tpu.memory_space<vmem>>, %arg4: memref<128x32xf32, #tpu.memory_space<vmem>>, %arg5: memref<1x128xf32, #tpu.memory_space<vmem>>) attributes {dimension_semantics = [#tpu.dimension_semantics<parallel>], iteration_bounds = array<i64: 1>, scalar_prefetch = 0 : i64, scratch_operands = 0 : i64, tpu.core_type = #tpu.core_type<tc>, window_params = [{transform_indices = @transform_0, window_bounds = array<i64: 1, 128>}, {transform_indices = @transform_1, window_bounds = array<i64: 1, 128>}, {pipeline_mode = #tpu.pipeline_mode<synchronous>, transform_indices = @transform_2, window_bounds = array<i64: 128, 16>}, {pipeline_mode = #tpu.pipeline_mode<synchronous>, transform_indices = @transform_3, window_bounds = array<i64: 128, 32>}, {transform_indices = @transform_4, window_bounds = array<i64: 1, 128>}]} {
    %c0 = arith.constant 0 : index
    %c0_0 = arith.constant 0 : index
    %0 = vector.load %arg1[%c0, %c0_0] : memref<1x128xi32, #tpu.memory_space<vmem>>, vector<1x128xi32>
    %c0_1 = arith.constant 0 : index
    %c0_2 = arith.constant 0 : index
    %1 = vector.load %arg2[%c0_1, %c0_2] : memref<1x128xi32, #tpu.memory_space<vmem>>, vector<1x128xi32>
    %2 = tpu.iota {dimensions = array<i32: 0>} : vector<16x128xi32>
    %3 = tpu.iota {dimensions = array<i32: 0>} : vector<32x128xi32>
    %4 = vector.broadcast %0 : vector<1x128xi32> to vector<16x128xi32>
    %5 = arith.cmpi eq, %2, %4 : vector<16x128xi32>
    %6 = arith.extui %5 : vector<16x128xi1> to vector<16x128xi32>
    %7 = arith.sitofp %6 : vector<16x128xi32> to vector<16x128xf32>
    %8 = vector.broadcast %1 : vector<1x128xi32> to vector<32x128xi32>
    %9 = arith.cmpi eq, %3, %8 : vector<32x128xi32>
    %10 = arith.extui %9 : vector<32x128xi1> to vector<32x128xi32>
    %11 = arith.sitofp %10 : vector<32x128xi32> to vector<32x128xf32>
    %c0_3 = arith.constant 0 : index
    %c0_4 = arith.constant 0 : index
    %12 = vector.load %arg3[%c0_3, %c0_4] : memref<128x16xf32, #tpu.memory_space<vmem>>, vector<128x16xf32>
    %cst = arith.constant dense<0.000000e+00> : vector<128x128xf32>
    %13 = tpu.matmul %12, %7, %cst {dimension_numbers = #tpu.dot_dimension_numbers<[1], [0], [0], [1], [0, 0, 1, 1], [], []>} : vector<128x16xf32>, vector<16x128xf32>, vector<128x128xf32> -> vector<128x128xf32>
    %c0_5 = arith.constant 0 : index
    %c0_6 = arith.constant 0 : index
    %14 = vector.load %arg4[%c0_5, %c0_6] : memref<128x32xf32, #tpu.memory_space<vmem>>, vector<128x32xf32>
    %cst_7 = arith.constant dense<0.000000e+00> : vector<128x128xf32>
    %15 = tpu.matmul %14, %11, %cst_7 {dimension_numbers = #tpu.dot_dimension_numbers<[1], [0], [0], [1], [0, 0, 1, 1], [], []>} : vector<128x32xf32>, vector<32x128xf32>, vector<128x128xf32> -> vector<128x128xf32>
    %16 = arith.mulf %13, %15 : vector<128x128xf32>
    %cst_8 = arith.constant dense<0.000000e+00> : vector<128xf32>
    %17 = vector.multi_reduction <add>, %16, %cst_8 [0] : vector<128x128xf32> to vector<128xf32>
    %18 = vector.shape_cast %17 : vector<128xf32> to vector<1x128xf32>
    %c0_9 = arith.constant 0 : index
    %c0_10 = arith.constant 0 : index
    %19 = vector.load %arg5[%c0_9, %c0_10] : memref<1x128xf32, #tpu.memory_space<vmem>>, vector<1x128xf32>
    tpu.vector_store %arg5[%c0_9, %c0_10], %18 {strides = array<i32>} : memref<1x128xf32, #tpu.memory_space<vmem>>, vector<1x128xf32>,
    return
  }
  func.func @transform_0(%arg0: i32) -> (i32, i32) {
    %c0_i32 = arith.constant 0 : i32
    %c0_i32_0 = arith.constant 0 : i32
    return %c0_i32, %arg0 : i32, i32
  }
  func.func @transform_1(%arg0: i32) -> (i32, i32) {
    %c0_i32 = arith.constant 0 : i32
    %c0_i32_0 = arith.constant 0 : i32
    return %c0_i32, %arg0 : i32, i32
  }
  func.func @transform_2(%arg0: i32) -> (i32, i32) {
    %c0_i32 = arith.constant 0 : i32
    %c0_i32_0 = arith.constant 0 : i32
    %c0_i32_1 = arith.constant 0 : i32
    return %c0_i32, %c0_i32_0 : i32, i32
  }
  func.func @transform_3(%arg0: i32) -> (i32, i32) {
    %c0_i32 = arith.constant 0 : i32
    %c0_i32_0 = arith.constant 0 : i32
    %c0_i32_1 = arith.constant 0 : i32
    return %c0_i32, %c0_i32_0 : i32, i32
  }
  func.func @transform_4(%arg0: i32) -> (i32, i32) {
    %c0_i32 = arith.constant 0 : i32
    %c0_i32_0 = arith.constant 0 : i32
    return %c0_i32, %arg0 : i32, i32
  }
}

</mosaic_0001>

<bundles_post_ra>
// kernel: tpu_custom_call.1
= control target key start
LH: loop header
LB: loop body
LE: loop exit
PB: predicated region body
PF: predicated region fallthrough
CT: control target
= control target key end

     0   :  { %v20_v0 = vlaneseq  ;;  %vm67_vm0 = vcmask 130048   ;;  %vm277_vm1 = vcmask 261120   ;;  %v705_v9 = vmov 1.0|1.0   ;;  %s878_s0 = inlined_call_operand.vmem [shape: s32[1,128], index: 0, kind: input, shape index: {}]   ;;  %s879_s1 = inlined_call_operand.vmem [shape: s32[1,128], index: 1, kind: input, shape index: {}]   ;;  %s880_s2 = inlined_call_operand.vmem [shape: f32[128,16], index: 2, kind: input, shape index: {}]   ;;  %s881_s3 = inlined_call_operand.vmem [shape: f32[128,32], index: 3, kind: input, shape index: {}]   ;;  %s882_s4 = inlined_call_operand.hbm [shape: f32[1,128], index: 4, kind: output, shape index: {}]  }
   0x1   :  { %v526_v1 = vld [vmem:[%s879_s1] ss:$0 sm:$0xff]  ;;  %v52_v10 = vld [vmem:[%s880_s2 + $0x8] sm:$0xff]  ;;  %v53_v11 = vld [vmem:[%s880_s2 + $0x10] sm:$0xff] }
   0x2   :  { %v51_v2 = vld [vmem:[%s880_s2] sm:$0xff]  ;;  %v21_v4 = vshrl.u32 %v20_v0, 7 }
   0x3   :  { %v261_v3 = vld [vmem:[%s881_s3] sm:$0xff]  ;;  %611 = vmatprep.mubr.msk.f32.mxu0 %vm67_vm0, %v51_v2 }
   0x4   :  { %v523_v5 = vld [vmem:[%s878_s0] ss:$0 sm:$0xff]  ;;  %643 = vmatprep.mubr.msk.f32.mxu1 %vm277_vm1, %v261_v3  ;;  %v22_v6 = vadd.s32 8, %v21_v4  ;;  %vm39_vm2 = vcmp.eq.s32.totalorder %v21_v4, %v526_v1  ;;  %v23_v7 = vadd.s32 16, %v21_v4  ;;  %v24_v8 = vadd.s32 24, %v21_v4 }
   0x5   :  { %vm29_vm3 = vcmp.eq.s32.totalorder %v21_v4, %v523_v5 }
   0x6   :  { %vm40_vm4 = vcmp.eq.s32.totalorder %v22_v6, %v526_v1  ;;  %vm30_vm5 = vcmp.eq.s32.totalorder %v22_v6, %v523_v5  ;;  %vm41_vm6 = vcmp.eq.s32.totalorder %v23_v7, %v526_v1  ;;  %vm42_vm8 = vcmp.eq.s32.totalorder %v24_v8, %v526_v1 }
   0x7   :  { %vm671_vm7 = vmpackc.low %vm40_vm4, %vm39_vm2 }
   0x8   :  { %672 = vmatprep.subr.msk.bf16.mxu1 %vm671_vm7, %v705_v9  ;;  %vm667_vm9 = vmpackc.low %vm30_vm5, %vm29_vm3 }
   0x9   :  { %674 = vmatpush3.bf16.msk.msra.mxu1 %vm671_vm7, %v705_v9  ;;  %668 = vmatprep.subr.msk.bf16.mxu0 %vm667_vm9, %v705_v9  ;;  %vm675_vm10 = vmpackc.low %vm42_vm8, %vm41_vm6 }
   0xa   :  { %670 = vmatpush3.bf16.msk.msra.mxu0 %vm667_vm9, %v705_v9  ;;  %676 = vmatprep.subr.msk.bf16.mxu1 %vm675_vm10, %v705_v9 }
   0xb   :  { %9 = vsyncpa [#allocation3], 0  ;;  %v262_v12 = vld [vmem:[%s881_s3 + $0x8] sm:$0xff]  ;;  %v54_v13 = vld [vmem:[%s880_s2 + $0x18] sm:$0xff] }
   0xc   :  { %v263_v14 = vld [vmem:[%s881_s3 + $0x10] sm:$0xff]  ;;  %v55_v15 = vld [vmem:[%s880_s2 + $0x20] sm:$0xff]  ;;  %v264_v16 = vld [vmem:[%s881_s3 + $0x18] sm:$0xff] }
   0xd   :  { %678 = vmatpush3.bf16.msk.msra.mxu1 %vm675_vm10, %v705_v9  ;;  %612 = vmatmul.mubr.msk.f32.vlgmr.msra.gmra.mrb[0].mxu0 %vm67_vm0, %v52_v10  ;;  %v56_v17 = vld [vmem:[%s880_s2 + $0x28] sm:$0xff]  ;;  %v265_v18 = vld [vmem:[%s881_s3 + $0x20] sm:$0xff]  ;;  %v57_v19 = vld [vmem:[%s880_s2 + $0x30] sm:$0xff] }
   0xe   :  { %614 = vmatprep.mubr.msk.f32.mxu0 %vm67_vm0, %v53_v11  ;;  %v266_v20 = vld [vmem:[%s881_s3 + $0x28] sm:$0xff]  ;;  %v58_v21 = vld [vmem:[%s880_s2 + $0x38] sm:$0xff]  ;;  %v267_v22 = vld [vmem:[%s881_s3 + $0x30] sm:$0xff] }
   0xf   :  { %v59_v23 = vld [vmem:[%s880_s2 + $0x40] sm:$0xff]  ;;  %v268_v24 = vld [vmem:[%s881_s3 + $0x38] sm:$0xff]  ;;  %v60_v25 = vld [vmem:[%s880_s2 + $0x48] sm:$0xff] }
  0x10   :  { %644 = vmatmul.mubr.msk.f32.vlgmr.msra.gmra.mrb[0].mxu1 %vm277_vm1, %v262_v12  ;;  %v269_v26 = vld [vmem:[%s881_s3 + $0x40] sm:$0xff]  ;;  %v61_v27 = vld [vmem:[%s880_s2 + $0x50] sm:$0xff]  ;;  %v270_v28 = vld [vmem:[%s881_s3 + $0x48] sm:$0xff] }
  0x11   :  { %615 = vmatmul.mubr.msk.f32.gmra.mrb[2].mxu0 %vm67_vm0, %v54_v13  ;;  %646 = vmatprep.mubr.msk.f32.mxu1 %vm277_vm1, %v263_v14  ;;  %v62_v29 = vld [vmem:[%s880_s2 + $0x58] sm:$0xff]  ;;  %v271_v30 = vld [vmem:[%s881_s3 + $0x50] sm:$0xff]  ;;  %v63_v31 = vld [vmem:[%s880_s2 + $0x60] sm:$0xff] }
  0x12   :  { %617 = vmatprep.mubr.msk.f32.mxu0 %vm67_vm0, %v55_v15  ;;  %v272_v32 = vld [vmem:[%s881_s3 + $0x58] sm:$0xff]  ;;  %v64_v33 = vld [vmem:[%s880_s2 + $0x68] sm:$0xff]  ;;  %v273_v34 = vld [vmem:[%s881_s3 + $0x60] sm:$0xff] }
  0x13   :  { %v65_v35 = vld [vmem:[%s880_s2 + $0x70] sm:$0xff]  ;;  %v274_v36 = vld [vmem:[%s881_s3 + $0x68] sm:$0xff]  ;;  %v66_v37 = vld [vmem:[%s880_s2 + $0x78] sm:$0xff]  ;;  %s706_s2 = smov [#allocation2]  }
  0x14   :  { %647 = vmatmul.mubr.msk.f32.gmra.mrb[2].mxu1 %vm277_vm1, %v264_v16  ;;  %v275_v38 = vld [vmem:[%s881_s3 + $0x70] sm:$0xff]  ;;  %v276_v39 = vld [vmem:[%s881_s3 + $0x78] sm:$0xff]  ;;  %s515_s3 = sshll.u32 %s706_s2, 4  ;;  %s516_s3 = int_to_ptr.vmem [resolvable:$true] %s515_s3 }
  0x15   :  { %618 = vmatmul.mubr.msk.f32.gmra.mrb[4].mxu0 %vm67_vm0, %v56_v17  ;;  %649 = vmatprep.mubr.msk.f32.mxu1 %vm277_vm1, %v265_v18  ;;  %s681_s25 = scalar_lea.vmem %s516_s3, 16  ;;  %s685_s26 = scalar_lea.vmem %s516_s3, 32 }
  0x16   :  { %620 = vmatprep.mubr.msk.f32.mxu0 %vm67_vm0, %v57_v19  ;;  %p682_p0 = scmp.ne.s32.totalorder %s516_s3, %s681_s25  ;;  %p686_p1 = scmp.lt.s32.totalorder %s516_s3, %s516_s3 }
  0x17   :  { %p687_p2 = scmp.lt.s32.totalorder %s685_s26, %s681_s25 }
  0x18   :  { %650 = vmatmul.mubr.msk.f32.gmra.mrb[4].mxu1 %vm277_vm1, %v266_v20 }
  0x19   :  { %621 = vmatmul.mubr.msk.f32.gmra.mrb[6].mxu0 %vm67_vm0, %v58_v21  ;;  %652 = vmatprep.mubr.msk.f32.mxu1 %vm277_vm1, %v267_v22  ;;  %p688_p3 = por %p687_p2, %p686_p1 }
  0x1a   :  { %623 = vmatprep.mubr.msk.f32.mxu0 %vm67_vm0, %v59_v23 }
  0x1b   :  { %p689_p4 = pnand %p688_p3, %p682_p0 }
  0x1c   :  { %653 = vmatmul.mubr.msk.f32.gmra.mrb[6].mxu1 %vm277_vm1, %v268_v24 }
  0x1d   :  { %624 = vmatmul.mubr.msk.f32.gmra.mrb[8].mxu0 %vm67_vm0, %v60_v25  ;;  %655 = vmatprep.mubr.msk.f32.mxu1 %vm277_vm1, %v269_v26 }
  0x1e   :  { %626 = vmatprep.mubr.msk.f32.mxu0 %vm67_vm0, %v61_v27 }
  0x20   :  { %656 = vmatmul.mubr.msk.f32.gmra.mrb[8].mxu1 %vm277_vm1, %v270_v28 }
  0x21   :  { %627 = vmatmul.mubr.msk.f32.gmra.mrb[10].mxu0 %vm67_vm0, %v62_v29  ;;  %658 = vmatprep.mubr.msk.f32.mxu1 %vm277_vm1, %v271_v30 }
  0x22   :  { %629 = vmatprep.mubr.msk.f32.mxu0 %vm67_vm0, %v63_v31 }
  0x24   :  { %659 = vmatmul.mubr.msk.f32.gmra.mrb[10].mxu1 %vm277_vm1, %v272_v32 }
  0x25   :  { %630 = vmatmul.mubr.msk.f32.gmra.mrb[12].mxu0 %vm67_vm0, %v64_v33  ;;  %661 = vmatprep.mubr.msk.f32.mxu1 %vm277_vm1, %v273_v34 }
  0x26   :  { %632 = vmatprep.mubr.msk.f32.mxu0 %vm67_vm0, %v65_v35 }
  0x28   :  { %662 = vmatmul.mubr.msk.f32.gmra.mrb[12].mxu1 %vm277_vm1, %v274_v36 }
  0x29   :  { %633 = vmatmul.mubr.msk.f32.gmra.mrb[14].mxu0 %vm67_vm0, %v66_v37  ;;  %664 = vmatprep.mubr.msk.f32.mxu1 %vm277_vm1, %v275_v38 }
  0x2c   :  { %665 = vmatmul.mubr.msk.f32.gmra.mrb[14].mxu1 %vm277_vm1, %v276_v39 }
  0xe0   :  { %v613_v40 = vpop.f32.mrb[0].mxu0 }
  0xe1   :  { %v182_v41 = vpop.f32.mrb[1].mxu0 }
  0xe3   :  { %v645_v42 = vpop.f32.mrb[0].mxu1 }
  0xe4   :  { %v472_v43 = vmul.f32 %v645_v42, %v613_v40  ;;  %v392_v44 = vpop.f32.mrb[1].mxu1  ;;  %v616_v45 = vpop.f32.mrb[2].mxu0 }
  0xe5   :  { %v471_v46 = vmul.f32 %v392_v44, %v182_v41  ;;  %v192_v47 = vpop.f32.mrb[3].mxu0 }
  0xe7   :  { %v487_v48 = vadd.f32 %v472_v43, %v471_v46  ;;  %v648_v49 = vpop.f32.mrb[2].mxu1 }
  0xe8   :  { %v474_v50 = vmul.f32 %v648_v49, %v616_v45  ;;  %v402_v51 = vpop.f32.mrb[3].mxu1  ;;  %v619_v52 = vpop.f32.mrb[4].mxu0 }
  0xe9   :  { %v473_v53 = vmul.f32 %v402_v51, %v192_v47  ;;  %v202_v54 = vpop.f32.mrb[5].mxu0 }
  0xeb   :  { %v488_v55 = vadd.f32 %v487_v48, %v473_v53  ;;  %v651_v56 = vpop.f32.mrb[4].mxu1 }
  0xec   :  { %v476_v57 = vmul.f32 %v651_v56, %v619_v52  ;;  %v412_v58 = vpop.f32.mrb[5].mxu1  ;;  %v622_v59 = vpop.f32.mrb[6].mxu0 }
  0xed   :  { %v475_v60 = vmul.f32 %v412_v58, %v202_v54  ;;  %v489_v61 = vadd.f32 %v488_v55, %v474_v50  ;;  %v212_v62 = vpop.f32.mrb[7].mxu0 }
  0xef   :  { %v490_v63 = vadd.f32 %v489_v61, %v475_v60  ;;  %v654_v0 = vpop.f32.mrb[6].mxu1 }
  0xf0   :  { %v478_v1 = vmul.f32 %v654_v0, %v622_v59  ;;  %v422_v2 = vpop.f32.mrb[7].mxu1  ;;  %v625_v3 = vpop.f32.mrb[8].mxu0 }
  0xf1   :  { %v477_v4 = vmul.f32 %v422_v2, %v212_v62  ;;  %v491_v5 = vadd.f32 %v490_v63, %v476_v57  ;;  %v222_v6 = vpop.f32.mrb[9].mxu0 }
  0xf3   :  { %v492_v7 = vadd.f32 %v491_v5, %v477_v4  ;;  %v657_v8 = vpop.f32.mrb[8].mxu1 }
  0xf4   :  { %v480_v9 = vmul.f32 %v657_v8, %v625_v3  ;;  %v432_v10 = vpop.f32.mrb[9].mxu1  ;;  %v628_v11 = vpop.f32.mrb[10].mxu0 }
  0xf5   :  { %v479_v12 = vmul.f32 %v432_v10, %v222_v6  ;;  %v493_v13 = vadd.f32 %v492_v7, %v478_v1  ;;  %v232_v14 = vpop.f32.mrb[11].mxu0 }
  0xf7   :  { %v494_v15 = vadd.f32 %v493_v13, %v479_v12  ;;  %v660_v16 = vpop.f32.mrb[10].mxu1 }
  0xf8   :  { %v482_v17 = vmul.f32 %v660_v16, %v628_v11  ;;  %v442_v18 = vpop.f32.mrb[11].mxu1  ;;  %v631_v19 = vpop.f32.mrb[12].mxu0 }
  0xf9   :  { %v481_v20 = vmul.f32 %v442_v18, %v232_v14  ;;  %v495_v21 = vadd.f32 %v494_v15, %v480_v9  ;;  %v242_v22 = vpop.f32.mrb[13].mxu0 }
  0xfb   :  { %v496_v23 = vadd.f32 %v495_v21, %v481_v20  ;;  %v663_v24 = vpop.f32.mrb[12].mxu1 }
  0xfc   :  { %v484_v25 = vmul.f32 %v663_v24, %v631_v19  ;;  %v452_v26 = vpop.f32.mrb[13].mxu1  ;;  %v634_v27 = vpop.f32.mrb[14].mxu0 }
  0xfd   :  { %v483_v28 = vmul.f32 %v452_v26, %v242_v22  ;;  %v497_v29 = vadd.f32 %v496_v23, %v482_v17  ;;  %v252_v30 = vpop.f32.mrb[15].mxu0 }
  0xff   :  { %v498_v31 = vadd.f32 %v497_v29, %v483_v28  ;;  %v666_v32 = vpop.f32.mrb[14].mxu1 }
 0x100   :  { %v486_v33 = vmul.f32 %v666_v32, %v634_v27  ;;  %v462_v34 = vpop.f32.mrb[15].mxu1 }
 0x101   :  { %v485_v35 = vmul.f32 %v462_v34, %v252_v30  ;;  %v499_v36 = vadd.f32 %v498_v31, %v484_v25 }
 0x103   :  { %v500_v37 = vadd.f32 %v499_v36, %v485_v35 }
 0x105   :  { %v501_v38 = vadd.f32 %v500_v37, %v486_v33 }
 0x107   :  { %v502_v39 = vrot.slane %v501_v38, 4 }
 0x109   :  { %v503_v40 = vadd.f32 %v502_v39, %v501_v38 }
 0x10b   :  { %v504_v41 = vrot.slane %v503_v40, 2 }
 0x10d   :  { %v505_v42 = vadd.f32 %v504_v41, %v503_v40 }
 0x10f   :  { %v506_v43 = vrot.slane %v505_v42, 1 }
 0x111   :  { %v507_v44 = vadd.f32 %v506_v43, %v505_v42 }
 0x113   :  { %508 = vst [vmem:[#allocation2] sm:$0x1] %v507_v44 }
 0x114   :  { %692 = shalt.err (!%p689_p4)
}
 0x115   :  { %s693_s29 = scalar_lea.hbm %s882_s4, 16 }
 0x116   :  { %p694_p5 = scmp.ne.s32.totalorder %s882_s4, %s693_s29  ;;  %p697_p6 = scmp.lt.u32.totalorder %s693_s29, %s882_s4 }
 0x118   :  { %p699_p7 = pnand %p697_p6, %p694_p5 }
 0x11a   :  { %702 = shalt.err (!%p699_p7)
}
 0x11b   :  { %518 = dma.vmem_to_hbm [thread:$0]  %s516_s3, 16, %s882_s4, [#allocation3]  }
 0x11c   :  { %703 = dma.done.wait [#allocation3], 16  }
 0x11d   :  { %704 = vsyncadd [#allocation3], 4294967280 }
 0x11e   :  { %522 = vsyncpa [#allocation3], 1 }

</bundles_post_ra>
